<compile_context>
chip_gen: v7x
topology: tpu7x:2x2x1
jax: 0.10.0
libtpu: 0.0.40
codegen_flags: <defaults>
</compile_context>

<pallas_src>
import math

import jax
import jax.numpy as jnp
from jax.experimental import pallas as pl
from jax.experimental.pallas import tpu as pltpu


def _plan_row_chunks(rows, max_chunks=4):
    """Split `rows` into up to `max_chunks` contiguous chunks whose starts are
    8-aligned (sublane-tile boundaries).  Returns a list of (start, size)."""
    if rows < 2 * 8:
        return [(0, rows)]
    n_chunks = min(max_chunks, rows // 8)
    base = max(8, ((rows // n_chunks) // 8) * 8)
    chunks = []
    start = 0
    for _ in range(n_chunks - 1):
        chunks.append((start, base))
        start += base
    chunks.append((start, rows - start))
    return chunks


def _make_hbm_copy_kernel(chunks):
    """Kernel: issue one HBM->HBM DMA per chunk, then wait on all of them."""

    def kernel(x_hbm, o_hbm, sems):
        copies = []
        for c, (start, size) in enumerate(chunks):
            cp = pltpu.make_async_copy(
                x_hbm.at[pl.ds(start, size)],
                o_hbm.at[pl.ds(start, size)],
                sems.at[c],
            )
            cp.start()
            copies.append(cp)
        for cp in copies:
            cp.wait()

    return kernel


def flatten(x, *, copy=True, max_dma_chunks=4):
    """Pallas equivalent of Flatten.forward: (N, ...) -> (N, prod(...)).

    copy=False : zero-cost metadata reshape (recommended inside a real graph).
    copy=True  : materialized result via a direct HBM->HBM DMA Pallas kernel.
    """
    N = x.shape[0]
    F = math.prod(x.shape[1:])
    x2 = x.reshape(N, F)  # row-major re-view; no data reordering

    if not copy:
        return x2

    chunks = _plan_row_chunks(N, max_chunks=max_dma_chunks)
    return pl.pallas_call(
        _make_hbm_copy_kernel(chunks),
        out_shape=jax.ShapeDtypeStruct((N, F), x.dtype),
        in_specs=[pl.BlockSpec(memory_space=pl.ANY)],
        out_specs=pl.BlockSpec(memory_space=pl.ANY),
        scratch_shapes=[pltpu.SemaphoreType.DMA((len(chunks),))],
    )(x2)


if __name__ == "__main__":
    key = jax.random.PRNGKey(0)
    k0, k1 = jax.random.split(key)

    # Primary shape consistent with a conv feature map: batch=2, C=4, H=W=16.
    x = jax.random.normal(k0, (2, 4, 16, 16), dtype=jnp.float32)
    y = flatten(x)  # Pallas HBM->HBM DMA copy path (single-chunk: N < 16)
    jax.block_until_ready(y)

    expected = x.reshape(x.shape[0], -1)
    assert y.shape == (2, 4 * 16 * 16), y.shape
    assert y.dtype == x.dtype
    assert bool(jnp.array_equal(y, expected)), "flatten mismatch vs reference"

    # Exercise the multi-chunk DMA path with a larger batch.
    x_big = jax.random.normal(k1, (32, 4, 8, 8), dtype=jnp.float32)
    y_big = flatten(x_big)
    jax.block_until_ready(y_big)
    assert bool(jnp.array_equal(y_big, x_big.reshape(32, -1))), "multi-chunk mismatch"

    # Zero-cost path (what a real graph should use) agrees too.
    y0 = flatten(x, copy=False)
    assert bool(jnp.array_equal(y0, expected))

    print("KERNEL_OK")
</pallas_src>

<mosaic_0001>
module attributes {stable_mosaic.version = 11 : i64} {
  func.func @kernel(%arg0: memref<2x1024xf32, #tpu.memory_space<any>>, %arg1: memref<2x1024xf32, #tpu.memory_space<any>>, %arg2: memref<1x!tpu.dma_semaphore, #tpu.memory_space<semaphore_mem>>) attributes {dimension_semantics = [], scalar_prefetch = 0 : i64, scratch_operands = 1 : i64, tpu.core_type = #tpu.core_type<tc>} {
    %c0_i32 = arith.constant 0 : i32
    %c0_i32_0 = arith.constant 0 : i32
    %c0_i32_1 = arith.constant 0 : i32
    %0 = tpu.memref_slice %arg0[%c0_i32_0, %c0_i32_1] : memref<2x1024xf32, #tpu.memory_space<any>> -> memref<2x1024xf32, #tpu.memory_space<any>>
    %c0_i32_2 = arith.constant 0 : i32
    %c0_i32_3 = arith.constant 0 : i32
    %1 = tpu.memref_slice %arg1[%c0_i32_2, %c0_i32_3] : memref<2x1024xf32, #tpu.memory_space<any>> -> memref<2x1024xf32, #tpu.memory_space<any>>
    %2 = tpu.memref_slice %arg2[%c0_i32] : memref<1x!tpu.dma_semaphore, #tpu.memory_space<semaphore_mem>> -> memref<1x!tpu.dma_semaphore, #tpu.memory_space<semaphore_mem>>
    %3 = tpu.memref_squeeze %2 : memref<1x!tpu.dma_semaphore, #tpu.memory_space<semaphore_mem>> -> memref<!tpu.dma_semaphore, #tpu.memory_space<semaphore_mem>>
    tpu.enqueue_dma source(%0 : memref<2x1024xf32, #tpu.memory_space<any>>) target(%1 : memref<2x1024xf32, #tpu.memory_space<any>>) target_semaphore(%3 : memref<!tpu.dma_semaphore, #tpu.memory_space<semaphore_mem>>)
    %c0_i32_4 = arith.constant 0 : i32
    %c0_i32_5 = arith.constant 0 : i32
    %c0_i32_6 = arith.constant 0 : i32
    %4 = tpu.memref_slice %arg0[%c0_i32_5, %c0_i32_6] : memref<2x1024xf32, #tpu.memory_space<any>> -> memref<2x1024xf32, #tpu.memory_space<any>>
    %c0_i32_7 = arith.constant 0 : i32
    %c0_i32_8 = arith.constant 0 : i32
    %5 = tpu.memref_slice %arg1[%c0_i32_7, %c0_i32_8] : memref<2x1024xf32, #tpu.memory_space<any>> -> memref<2x1024xf32, #tpu.memory_space<any>>
    %6 = tpu.memref_slice %arg2[%c0_i32_4] : memref<1x!tpu.dma_semaphore, #tpu.memory_space<semaphore_mem>> -> memref<1x!tpu.dma_semaphore, #tpu.memory_space<semaphore_mem>>
    %7 = tpu.memref_squeeze %6 : memref<1x!tpu.dma_semaphore, #tpu.memory_space<semaphore_mem>> -> memref<!tpu.dma_semaphore, #tpu.memory_space<semaphore_mem>>
    tpu.wait_dma2 semaphore(%7 : memref<!tpu.dma_semaphore, #tpu.memory_space<semaphore_mem>>) src(%4 : memref<2x1024xf32, #tpu.memory_space<any>>) dst(%5 : memref<2x1024xf32, #tpu.memory_space<any>>)
    return
  }
}

</mosaic_0001>

<bundles_post_ra>
// kernel: tpu_custom_call.1
= control target key start
LH: loop header
LB: loop body
LE: loop exit
PB: predicated region body
PF: predicated region fallthrough
CT: control target
= control target key end

     0   :  { %s35_s6 = smov [#allocation2]   ;;  %s36_s7 = smov [#allocation3]   ;;  %s54_s0 = inlined_call_operand.hbm [shape: f32[2,1024], index: 0, kind: input, shape index: {}]   ;;  %s55_s1 = inlined_call_operand.hbm [shape: f32[2,1024], index: 1, kind: output, shape index: {}]  }
   0x1   :  { %s37_s8 = smov 0  }
   0x2   :  { %18 = dma.general %s54_s0, 256, %s55_s1, %s35_s6, %s36_s7, [#allocation4], %s37_s8, 0  }
   0x3   :  { %33 = dma.done.wait [#allocation2], 256 }
   0x4   :  { %34 = vsyncadd [#allocation2], 4294967040 }
   0x5   :  { %23 = vsyncmov [#allocation2] }
   0x8   :  { %s24_s13 = vpop.sfrf %23 }
   0x9   :  { %p29_p0 = scmp.ne.s32.totalorder %s24_s13, 0 }
   0xb   :  { %28 = shalt.err (%p29_p0)  }

</bundles_post_ra>
